<compile_context>
chip_gen: v5e
topology: v5e:2x2
jax: 0.10.0
libtpu: 0.0.40
codegen_flags: <defaults>
</compile_context>

<pallas_src>
import functools

import jax
import jax.numpy as jnp
from jax.experimental import pallas as pl
from jax.experimental.pallas import tpu as pltpu


def _round_up(v, m):
    return ((v + m - 1) // m) * m


def _linear_kernel(x_ref, w_ref, b_ref, o_ref):
    # x_ref: (B, F)   w_ref: (F, Np)  (pre-transposed, lane-dense Np)
    # b_ref: (1, Np)  o_ref: (B, Np)
    acc = jnp.dot(x_ref[...], w_ref[...], preferred_element_type=jnp.float32)
    o_ref[...] = (acc + b_ref[...]).astype(o_ref.dtype)


def prepare_classifier_params(weight, bias):
    """One-time parameter prep (amortized: do NOT call per forward).

    weight: (N, F) PyTorch layout; bias: (N,).
    Returns:
      w_fp: (F, Np) pre-transposed, label dim zero-padded to a multiple of 128
            so the kernel's output store is a full unmasked lane-dense vst.
      b_p:  (1, Np) zero-padded bias.
    Zero-padded weight columns / bias entries produce zero logits in columns
    N..Np-1, which the forward slices away, so semantics are unchanged.
    """
    n, _ = weight.shape
    np_ = _round_up(max(n, 128), 128)
    w_fp = jnp.pad(weight, ((0, np_ - n), (0, 0))).T  # (F, Np)
    b_p = jnp.pad(bias, (0, np_ - n)).reshape(1, np_)  # (1, Np)
    return jax.device_put(w_fp), jax.device_put(b_p)


@functools.partial(jax.jit, static_argnames=("num_labels",))
def classifier_forward(x, w_fp, b_p, *, num_labels):
    """x: (B, F) float32; w_fp: (F, Np); b_p: (1, Np). Returns (B, num_labels)."""
    b, f = x.shape
    np_ = w_fp.shape[1]

    out_p = pl.pallas_call(
        _linear_kernel,
        out_shape=jax.ShapeDtypeStruct((b, np_), x.dtype),
        in_specs=[
            pl.BlockSpec(memory_space=pltpu.MemorySpace.VMEM),
            pl.BlockSpec(memory_space=pltpu.MemorySpace.VMEM),
            pl.BlockSpec(memory_space=pltpu.MemorySpace.VMEM),
        ],
        out_specs=pl.BlockSpec(memory_space=pltpu.MemorySpace.VMEM),
        cost_estimate=pl.CostEstimate(
            flops=2 * b * f * np_,
            transcendentals=0,
            bytes_accessed=4 * (b * f + f * np_ + np_ + b * np_),
        ),
    )(x, w_fp, b_p)

    # Lane-only slice; padded columns hold exact zeros.
    return out_p[:, :num_labels]


if __name__ == "__main__":
    # Module hyperparameters (small, consistent with the forward):
    avgpool_to = 8
    n_out_channels = 4
    num_labels = 10
    in_features = avgpool_to * n_out_channels  # 32
    batch = 2

    key = jax.random.PRNGKey(0)
    kx, kw, kb = jax.random.split(key, 3)

    # Deterministic synthetic parameters (PyTorch-style uniform init range,
    # PyTorch (N, F) weight layout).
    bound = 1.0 / (in_features ** 0.5)
    weight = jax.random.uniform(
        kw, (num_labels, in_features), jnp.float32, -bound, bound
    )
    bias = jax.random.uniform(kb, (num_labels,), jnp.float32, -bound, bound)

    # Input: flattened pooled features, shape (batch, avgpool_to * n_out_channels).
    x = jax.random.normal(kx, (batch, in_features), jnp.float32)

    # One-time parameter prep (pad + transpose), then the hot forward path.
    w_fp, b_p = prepare_classifier_params(weight, bias)
    out = classifier_forward(x, w_fp, b_p, num_labels=num_labels)
    out = jax.block_until_ready(out)

    # Reference check in plain JAX.
    ref = x @ weight.T + bias
    assert out.shape == (batch, num_labels)
    assert jnp.allclose(out, ref, atol=1e-5, rtol=1e-5)

    print("KERNEL_OK")
</pallas_src>

<mosaic_0001>
module attributes {stable_mosaic.version = 11 : i64} {
  func.func @_linear_kernel(%arg0: memref<2x32xf32, #tpu.memory_space<vmem>>, %arg1: memref<32x128xf32, #tpu.memory_space<vmem>>, %arg2: memref<1x128xf32, #tpu.memory_space<vmem>>, %arg3: memref<2x128xf32, #tpu.memory_space<vmem>>) attributes {dimension_semantics = [], scalar_prefetch = 0 : i64, scratch_operands = 0 : i64, tpu.core_type = #tpu.core_type<tc>} {
    %c0 = arith.constant 0 : index
    %c0_0 = arith.constant 0 : index
    %0 = vector.load %arg0[%c0, %c0_0] : memref<2x32xf32, #tpu.memory_space<vmem>>, vector<2x32xf32>
    %c0_1 = arith.constant 0 : index
    %c0_2 = arith.constant 0 : index
    %1 = vector.load %arg1[%c0_1, %c0_2] : memref<32x128xf32, #tpu.memory_space<vmem>>, vector<32x128xf32>
    %cst = arith.constant dense<0.000000e+00> : vector<2x128xf32>
    %2 = tpu.matmul %0, %1, %cst {dimension_numbers = #tpu.dot_dimension_numbers<[1], [0], [0], [1], [0, 0, 1, 1], [], []>} : vector<2x32xf32>, vector<32x128xf32>, vector<2x128xf32> -> vector<2x128xf32>
    %c0_3 = arith.constant 0 : index
    %c0_4 = arith.constant 0 : index
    %3 = vector.load %arg2[%c0_3, %c0_4] : memref<1x128xf32, #tpu.memory_space<vmem>>, vector<1x128xf32>
    %4 = vector.broadcast %3 : vector<1x128xf32> to vector<2x128xf32>
    %5 = arith.addf %2, %4 : vector<2x128xf32>
    %c0_5 = arith.constant 0 : index
    %c0_6 = arith.constant 0 : index
    %6 = vector.load %arg3[%c0_5, %c0_6] : memref<2x128xf32, #tpu.memory_space<vmem>>, vector<2x128xf32>
    tpu.vector_store %arg3[%c0_5, %c0_6], %5 {strides = array<i32>} : memref<2x128xf32, #tpu.memory_space<vmem>>, vector<2x128xf32>,
    return
  }
}

</mosaic_0001>

<bundles_post_ra>
// kernel: classifier_forward.1
= control target key start
LH: loop header
LB: loop body
LE: loop exit
PB: predicated region body
PF: predicated region fallthrough
CT: control target
= control target key end

     0   :  { %8 = vsyncpa [#allocation3], 0  ;;  %s219_s0 = inlined_call_operand.hbm [shape: f32[2,32], index: 0, kind: input, shape index: {}]   ;;  %s220_s1 = inlined_call_operand.hbm [shape: f32[32,128], index: 1, kind: input, shape index: {}]   ;;  %s221_s2 = inlined_call_operand.vmem [shape: f32[1,128], index: 2, kind: input, shape index: {}]   ;;  %s222_s3 = inlined_call_operand.hbm [shape: f32[2,128], index: 3, kind: output, shape index: {}]  }
   0x1   :  { %9 = vsyncpa [#allocation6], 0 }
   0x2   :  { %10 = vsyncpa [#allocation4], 0  ;;  %s16_s14 = sshll.u32 %s219_s0, 4  ;;  %s182_s15 = smov [#allocation2]   ;;  %s17_s14 = int_to_ptr.hbm [resolvable:$true] %s16_s14 }
   0x3   :  { %s18_s16 = sshll.u32 %s182_s15, 4  ;;  %s26_s19 = sshll.u32 %s220_s1, 4  ;;  %s19_s16 = int_to_ptr.vmem [resolvable:$true] %s18_s16  ;;  %s27_s19 = int_to_ptr.hbm [resolvable:$true] %s26_s19 }
   0x4   :  { %21 = dma.hbm_to_vmem [thread:$0]  %s17_s14, 32, %s19_s16, [#allocation3]  }
   0x5   :  { %s183_s20 = smov [#allocation5]   ;;  %s184_s22 = smov 128  }
   0x6   :  { %s28_s21 = sshll.u32 %s183_s20, 4  ;;  %s185_s23 = smov 8   ;;  %s29_s21 = int_to_ptr.vmem [resolvable:$true] %s28_s21 }
   0x7   :  { %34 = dma.hbm_to_vmem [thread:$0]  %s27_s19, 512, %s29_s21, [#allocation6], %s184_s22, %s184_s22, %s185_s23  }
   0x8   :  { %176 = dma.done.wait [#allocation3], 32  }
   0x9   :  { %177 = vsyncadd [#allocation3], 4294967264 }
   0xa   :  { %178 = dma.done.wait [#allocation6], 512  }
   0xb   :  { %179 = vsyncadd [#allocation6], 4294966784  ;;  %v49_v0 = vld [vmem:[#allocation5 + $0x18] sm:$0xff]  ;;  %v48_v1 = vld [vmem:[#allocation5 + $0x10] sm:$0xff]  ;;  %vm54_vm0 = vcmask 261120   ;;  %s186_s24 = smov [#allocation7]  }
   0xc   :  { %70 = vmatpush.msra.mxu0 %v49_v0  ;;  %v47_v2 = vld [vmem:[#allocation5 + $0x8] sm:$0xff]  ;;  %v46_v3 = vld [vmem:[#allocation5] sm:$0xff]  ;;  %v45_v4 = vld [vmem:[#allocation2] sm:$0x3]  ;;  %s84_s25 = sshll.u32 %s186_s24, 4  ;;  %s86_s28 = sshll.u32 %s222_s3, 4  ;;  %s85_s25 = int_to_ptr.vmem [resolvable:$true] %s84_s25  ;;  %s87_s28 = int_to_ptr.hbm [resolvable:$true] %s86_s28 }
   0xd   :  { %v103_v5 = vld [vmem:[%s221_s2] ss:$0 sm:$0xff] }
   0xe   :  { %71 = vmatpush.msra.mxu0 %v48_v1 }
  0x10   :  { %72 = vmatpush.msra.mxu0 %v47_v2 }
  0x12   :  { %73 = vmatpush.msra.mxu0 %v46_v3 }
  0x13   :  { %97 = vmatmul.msk.f32.vlgmr.msra.gmra.mxu0 %vm54_vm0, %v45_v4 }
  0x90   :  { %v75_v6 = vpop.f32.mrf.mxu0 }
  0x91   :  { %v76_v7 = vadd.f32 %v103_v5, %v75_v6 }
  0x93   :  { %78 = vst [vmem:[#allocation7] sm:$0x3] %v76_v7 }
  0x94   :  { %89 = dma.vmem_to_hbm [thread:$0]  %s85_s25, 32, %s87_s28, [#allocation4]  }
  0x95   :  { %180 = dma.done.wait [#allocation4], 32  }
  0x96   :  { %181 = vsyncadd [#allocation4], 4294967264 }
  0x97   :  { %94 = vsyncpa [#allocation3], 1 }
  0x98   :  { %95 = vsyncpa [#allocation6], 1 }
  0x99   :  { %96 = vsyncpa [#allocation4], 1 }

</bundles_post_ra>
